<compile_context>
chip_gen: v7x
topology: tpu7x:2x2x1
jax: 0.10.0
libtpu: 0.0.40
codegen_flags: <defaults>
</compile_context>

<pallas_src>
import jax
import jax.numpy as jnp
from jax.experimental import pallas as pl
from jax.experimental.pallas import tpu as pltpu


# ----------------------------------------------------------------------------
# Fused kernel: NC1 -> NC2 -> NC3_1/NC3_2 -> FC1 heads (all MXU, bf16/f32)
# ----------------------------------------------------------------------------
def _net16x8_kernel(org_ref, pre_ref, qp_ref,
                    w1_ref, b1_ref,
                    w2_ref, b2_ref,
                    w3_ref, b3_ref,
                    wfc_ref, wqp_ref, bfc_ref,
                    out_ref):
    f32 = jnp.float32
    bf16 = jnp.bfloat16

    # ---- NC1: 3x3 / stride-1 / pad-1 conv as ONE band-matrix MXU dot -------
    # org_ref: (TB, 128) bf16, flat pixel = h*8 + w.  w1_ref: (128, 128) bf16
    # band matrix built at prep time (edge masks baked in as zeros).
    t1 = jnp.maximum(
        jnp.dot(org_ref[...], w1_ref[...], preferred_element_type=f32)
        + b1_ref[...],
        0.0)                                              # (TB, 128) f32

    # ---- NC2: cat((T, pre), ch) == lane concat; kernel==stride conv is -----
    # ---- exactly one pre-scattered (256, 16) GEMM ---------------------------
    x2 = jnp.concatenate([t1.astype(bf16), pre_ref[...]], axis=-1)  # (TB,256)
    t2 = jnp.maximum(
        jnp.dot(x2, w2_ref[...], preferred_element_type=f32) + b2_ref[...],
        0.0)                                              # (TB, 16) f32

    # ---- NC3_1 / NC3_2 fused: 2x2 stride-2 conv on a 2x2 map == full -------
    # ---- contraction over K=16; both branches share one (16, 18) weight ----
    t3 = jnp.maximum(
        jnp.dot(t2.astype(bf16), w3_ref[...], preferred_element_type=f32)
        + b3_ref[...],
        0.0)                                              # (TB, 18) f32

    # ---- both FC1 heads fused via a block-diagonal (18, 4) weight; ----------
    # ---- qp normalisation already folded into wqp / bfc ---------------------
    heads = jnp.dot(t3.astype(bf16), wfc_ref[...],
                    preferred_element_type=f32)           # (TB, 4) f32
    out_ref[...] = (heads + qp_ref[...] * wqp_ref[...] + bfc_ref[...]
                    ).astype(out_ref.dtype)


# ----------------------------------------------------------------------------
# Batch tiling: pad to (8,128)/bf16-friendly tiles; >=2 grid steps when large
# so the "parallel" axis shards across v7x's two TensorCores; tiles capped at
# 4096 rows so double-buffered blocks + intermediates fit v7x's 64 MiB VMEM.
# ----------------------------------------------------------------------------
def _round_up(x, m):
    return ((x + m - 1) // m) * m


def _batch_tiling(b):
    if b <= 512:
        pad_b = _round_up(b, 16)          # 16: bf16 sublane packing friendly
        return pad_b, pad_b               # one resident tile, grid=(1,)
    max_tile = 4096
    steps = max(2, -(-b // max_tile))     # cdiv, and at least 2 grid steps
    tile = _round_up(-(-b // steps), 16)  # <= 4096, multiple of 16
    return steps * tile, tile


# ----------------------------------------------------------------------------
# One-time weight preparation (outside the jitted forward): put every stage
# into GEMM layout so the kernel never reshapes / transposes / concatenates
# weights, and fold the qp normalisation into FC1.
# ----------------------------------------------------------------------------
def prepare_weights(params):
    f32, bf16 = jnp.float32, jnp.bfloat16

    # NC1: (128, 128) band matrix.  Band[p_in, p_out] = w1[di+1, dj+1] where
    # p_out = h*8+w and p_in = (h+di)*8 + (w+dj) is in-bounds (pad-1 edges are
    # simply zero rows/cols -> masks baked in).
    rows, cols, taps = [], [], []
    for h in range(16):
        for w in range(8):
            for di in (-1, 0, 1):
                for dj in (-1, 0, 1):
                    hi, wi = h + di, w + dj
                    if 0 <= hi < 16 and 0 <= wi < 8:
                        rows.append(hi * 8 + wi)
                        cols.append(h * 8 + w)
                        taps.append((di + 1) * 3 + (dj + 1))
    w1flat = params["NC1_w"].reshape(9).astype(f32)
    w1band = jnp.zeros((128, 128), f32).at[
        jnp.array(rows), jnp.array(cols)].set(w1flat[jnp.array(taps)])
    w1band = w1band.astype(bf16)
    b1 = jnp.full((1, 128), params["NC1_b"][0], f32)

    # NC2: kernel == stride, so scatter the OIHW weights into a dense
    # (flat_pixel, out_feature) matrix per input channel.  Row order matches
    # the row-major (h, w) flatten of the 16x8 image (rows 0..127 = T channel,
    # 128..255 = pre channel); column order is (o, oh, ow), exactly the
    # (c, kh, kw) flatten NC3 consumes.
    w2 = params["NC2_w"].astype(f32)                      # (4, 2, 8, 4) OIHW
    w2_chwo = jnp.transpose(w2, (1, 2, 3, 0))             # (c, kh, kw, o)
    W2 = jnp.zeros((2, 2, 8, 2, 4, 4, 2, 2), f32)         # c,oh,kh,ow,kw,o,oh',ow'
    for oh in range(2):
        for ow in range(2):
            W2 = W2.at[:, oh, :, ow, :, :, oh, ow].set(w2_chwo)
    w2_full = W2.reshape(256, 16).astype(bf16)            # multiplies [T, pre]
    b2 = jnp.repeat(params["NC2_b"].astype(f32), 4).reshape(1, 16)

    # NC3_{1,2}: 2x2/stride-2 conv on a 2x2 map == full contraction (K=16),
    # fused into one (16, 18) weight.
    w31 = params["NC3_1_w"].reshape(9, 16).T              # (16, 9)
    w32 = params["NC3_2_w"].reshape(9, 16).T              # (16, 9)
    w3 = jnp.concatenate([w31, w32], axis=1).astype(bf16)  # (16, 18)
    b3 = jnp.concatenate([params["NC3_1_b"], params["NC3_2_b"]]
                         ).reshape(1, 18).astype(f32)

    # FC1 (both heads use it): block-diagonal (18, 4) weight; qp column kept
    # in f32 with the /64 - 0.5 normalisation folded into it and the bias.
    wfct = params["FC1_w"][:, :9].T.astype(f32)            # (9, 2)
    wfc = jnp.zeros((18, 4), f32)
    wfc = wfc.at[:9, :2].set(wfct).at[9:, 2:].set(wfct)
    wfc = wfc.astype(bf16)
    wqp = (params["FC1_w"][:, 9] / 64.0).astype(f32)       # (2,)
    badj = (params["FC1_b"] - 0.5 * params["FC1_w"][:, 9]).astype(f32)
    wqp4 = jnp.concatenate([wqp, wqp]).reshape(1, 4)
    bfc4 = jnp.concatenate([badj, badj]).reshape(1, 4)

    return dict(w1band=w1band, b1=b1, w2=w2_full, b2=b2, w3=w3, b3=b3,
                wfc=wfc, wqp=wqp4, bfc=bfc4)


# ----------------------------------------------------------------------------
# Forward pass: single fused pallas_call.
# ----------------------------------------------------------------------------
def net16x8_forward(prepped, org, pre, qp):
    B = org.shape[0]
    assert org.shape == (B, 1, 16, 8) and pre.shape == (B, 1, 16, 8)
    assert qp.shape == (B, 1)

    # Stream activations as bf16 (MXU operands only) -> ~50% less HBM input.
    org_flat = org.reshape(B, 128).astype(jnp.bfloat16)
    pre_flat = pre.reshape(B, 128).astype(jnp.bfloat16)
    qp32 = qp.reshape(B, 1).astype(jnp.float32)

    pad_b, tile_b = _batch_tiling(B)
    if pad_b != B:
        pad = pad_b - B
        org_flat = jnp.pad(org_flat, ((0, pad), (0, 0)))
        pre_flat = jnp.pad(pre_flat, ((0, pad), (0, 0)))
        qp32 = jnp.pad(qp32, ((0, pad), (0, 0)))

    grid = (pad_b // tile_b,)
    act_spec = pl.BlockSpec((tile_b, 128), lambda i: (i, 0))
    qp_spec = pl.BlockSpec((tile_b, 1), lambda i: (i, 0))
    out_spec = pl.BlockSpec((tile_b, 4), lambda i: (i, 0))
    vmem = pl.BlockSpec(memory_space=pltpu.MemorySpace.VMEM)

    out = pl.pallas_call(
        _net16x8_kernel,
        out_shape=jax.ShapeDtypeStruct((pad_b, 4), jnp.float32),
        grid=grid,
        in_specs=[act_spec, act_spec, qp_spec,   # org, pre, qp (tiled)
                  vmem, vmem,                    # NC1: w1band, b1
                  vmem, vmem,                    # NC2: w2, b2
                  vmem, vmem,                    # NC3: w3, b3
                  vmem, vmem, vmem],             # FC1: wfc, wqp, bfc
        out_specs=out_spec,
        compiler_params=pltpu.CompilerParams(
            dimension_semantics=("parallel",),       # megacore/v7x sharding
            vmem_limit_bytes=48 * 1024 * 1024),      # fits v7x 64 MiB VMEM
    )(org_flat, pre_flat, qp32,
      prepped["w1band"], prepped["b1"],
      prepped["w2"], prepped["b2"],
      prepped["w3"], prepped["b3"],
      prepped["wfc"], prepped["wqp"], prepped["bfc"])

    out = out[:B]
    return out[:, :2], out[:, 2:]


# ----------------------------------------------------------------------------
# Parameter init (deterministic, PyTorch-default-style uniform(-1/sqrt(fan_in)))
# ----------------------------------------------------------------------------
def init_params(key):
    def u(key, shape, fan_in):
        bound = 1.0 / jnp.sqrt(float(fan_in))
        return jax.random.uniform(key, shape, jnp.float32, -bound, bound)

    keys = jax.random.split(key, 12)
    p = {}
    p["NC1_w"] = u(keys[0], (1, 1, 3, 3), 1 * 3 * 3)
    p["NC1_b"] = u(keys[1], (1,), 1 * 3 * 3)
    p["NC2_w"] = u(keys[2], (4, 2, 8, 4), 2 * 8 * 4)
    p["NC2_b"] = u(keys[3], (4,), 2 * 8 * 4)
    p["NC3_1_w"] = u(keys[4], (9, 4, 2, 2), 4 * 2 * 2)
    p["NC3_1_b"] = u(keys[5], (9,), 4 * 2 * 2)
    p["NC3_2_w"] = u(keys[6], (9, 4, 2, 2), 4 * 2 * 2)
    p["NC3_2_b"] = u(keys[7], (9,), 4 * 2 * 2)
    p["FC1_w"] = u(keys[8], (2, 10), 10)
    p["FC1_b"] = u(keys[9], (2,), 10)
    p["FC2_w"] = u(keys[10], (2, 10), 10)   # unused in forward, kept for parity
    p["FC2_b"] = u(keys[11], (2,), 10)
    return p


# ----------------------------------------------------------------------------
# Pure-JAX reference (for correctness check)
# ----------------------------------------------------------------------------
def ref_forward(params, org, pre, qp):
    prec = jax.lax.Precision.HIGHEST

    def conv(x, w, b, stride, pad):
        y = jax.lax.conv_general_dilated(
            x, w, window_strides=stride, padding=pad,
            dimension_numbers=("NCHW", "OIHW", "NCHW"), precision=prec)
        return y + b.reshape(1, -1, 1, 1)

    T = jax.nn.relu(conv(org, params["NC1_w"], params["NC1_b"], (1, 1),
                         ((1, 1), (1, 1))))
    T = jax.nn.relu(conv(jnp.concatenate([T, pre], axis=1),
                         params["NC2_w"], params["NC2_b"], (8, 4),
                         ((0, 0), (0, 0))))
    T1 = jax.nn.relu(conv(T, params["NC3_1_w"], params["NC3_1_b"], (2, 2),
                          ((0, 0), (0, 0))))[:, :, 0, 0]
    T2 = jax.nn.relu(conv(T, params["NC3_2_w"], params["NC3_2_b"], (2, 2),
                          ((0, 0), (0, 0))))[:, :, 0, 0]
    qpn = qp / 64.0 - 0.5
    x1 = jnp.concatenate([T1, qpn], axis=1) @ params["FC1_w"].T + params["FC1_b"]
    x2 = jnp.concatenate([T2, qpn], axis=1) @ params["FC1_w"].T + params["FC1_b"]
    return x1, x2


# ----------------------------------------------------------------------------
if __name__ == "__main__":
    key = jax.random.PRNGKey(0)
    pkey, k1, k2, k3 = jax.random.split(key, 4)
    params = init_params(pkey)
    prepped = prepare_weights(params)     # once, outside the jitted forward

    B = 2
    org = jax.random.normal(k1, (B, 1, 16, 8), jnp.float32)
    pre = jax.random.normal(k2, (B, 1, 16, 8), jnp.float32)
    qp = jax.random.uniform(k3, (B, 1), jnp.float32, 0.0, 51.0)

    fwd = jax.jit(net16x8_forward)
    x1, x2 = fwd(prepped, org, pre, qp)
    jax.block_until_ready((x1, x2))

    r1, r2 = ref_forward(params, org, pre, qp)
    assert x1.shape == (B, 2) and x2.shape == (B, 2)
    assert bool(jnp.all(jnp.isfinite(x1))) and bool(jnp.all(jnp.isfinite(x2)))
    assert bool(jnp.allclose(x1, r1, atol=5e-2, rtol=5e-2)), (x1, r1)
    assert bool(jnp.allclose(x2, r2, atol=5e-2, rtol=5e-2)), (x2, r2)

    print("KERNEL_OK")
</pallas_src>

<mosaic_0001>
module attributes {stable_mosaic.version = 11 : i64} {
  func.func @_net16x8_kernel(%arg0: i32, %arg1: memref<16x128xbf16, #tpu.memory_space<vmem>>, %arg2: memref<16x128xbf16, #tpu.memory_space<vmem>>, %arg3: memref<16x1xf32, #tpu.memory_space<vmem>>, %arg4: memref<128x128xbf16, #tpu.memory_space<vmem>>, %arg5: memref<1x128xf32, #tpu.memory_space<vmem>>, %arg6: memref<256x16xbf16, #tpu.memory_space<vmem>>, %arg7: memref<1x16xf32, #tpu.memory_space<vmem>>, %arg8: memref<16x18xbf16, #tpu.memory_space<vmem>>, %arg9: memref<1x18xf32, #tpu.memory_space<vmem>>, %arg10: memref<18x4xbf16, #tpu.memory_space<vmem>>, %arg11: memref<1x4xf32, #tpu.memory_space<vmem>>, %arg12: memref<1x4xf32, #tpu.memory_space<vmem>>, %arg13: memref<16x4xf32, #tpu.memory_space<vmem>>) attributes {dimension_semantics = [#tpu.dimension_semantics<parallel>], iteration_bounds = array<i64: 1>, scalar_prefetch = 0 : i64, scratch_operands = 0 : i64, tpu.core_type = #tpu.core_type<tc>, window_params = [{transform_indices = @transform_0, window_bounds = array<i64: 16, 128>}, {transform_indices = @transform_1, window_bounds = array<i64: 16, 128>}, {transform_indices = @transform_2, window_bounds = array<i64: 16, 1>}, {pipeline_mode = #tpu.pipeline_mode<synchronous>, transform_indices = @transform_3, window_bounds = array<i64: 128, 128>}, {pipeline_mode = #tpu.pipeline_mode<synchronous>, transform_indices = @transform_4, window_bounds = array<i64: 1, 128>}, {pipeline_mode = #tpu.pipeline_mode<synchronous>, transform_indices = @transform_5, window_bounds = array<i64: 256, 16>}, {pipeline_mode = #tpu.pipeline_mode<synchronous>, transform_indices = @transform_6, window_bounds = array<i64: 1, 16>}, {pipeline_mode = #tpu.pipeline_mode<synchronous>, transform_indices = @transform_7, window_bounds = array<i64: 16, 18>}, {pipeline_mode = #tpu.pipeline_mode<synchronous>, transform_indices = @transform_8, window_bounds = array<i64: 1, 18>}, {pipeline_mode = #tpu.pipeline_mode<synchronous>, transform_indices = @transform_9, window_bounds = array<i64: 18, 4>}, {pipeline_mode = #tpu.pipeline_mode<synchronous>, transform_indices = @transform_10, window_bounds = array<i64: 1, 4>}, {pipeline_mode = #tpu.pipeline_mode<synchronous>, transform_indices = @transform_11, window_bounds = array<i64: 1, 4>}, {transform_indices = @transform_12, window_bounds = array<i64: 16, 4>}]} {
    %c0 = arith.constant 0 : index
    %c0_0 = arith.constant 0 : index
    %0 = vector.load %arg1[%c0, %c0_0] : memref<16x128xbf16, #tpu.memory_space<vmem>>, vector<16x128xbf16>
    %c0_1 = arith.constant 0 : index
    %c0_2 = arith.constant 0 : index
    %1 = vector.load %arg4[%c0_1, %c0_2] : memref<128x128xbf16, #tpu.memory_space<vmem>>, vector<128x128xbf16>
    %cst = arith.constant dense<0.000000e+00> : vector<16x128xf32>
    %2 = tpu.matmul %0, %1, %cst {dimension_numbers = #tpu.dot_dimension_numbers<[1], [0], [0], [1], [0, 0, 1, 1], [], []>} : vector<16x128xbf16>, vector<128x128xbf16>, vector<16x128xf32> -> vector<16x128xf32>
    %c0_3 = arith.constant 0 : index
    %c0_4 = arith.constant 0 : index
    %3 = vector.load %arg5[%c0_3, %c0_4] : memref<1x128xf32, #tpu.memory_space<vmem>>, vector<1x128xf32>
    %4 = vector.broadcast %3 : vector<1x128xf32> to vector<16x128xf32>
    %5 = arith.addf %2, %4 : vector<16x128xf32>
    %cst_5 = arith.constant 0.000000e+00 : f32
    %6 = vector.broadcast %cst_5 : f32 to vector<16x128xf32>
    %7 = arith.maximumf %5, %6 : vector<16x128xf32>
    %8 = arith.truncf %7 : vector<16x128xf32> to vector<16x128xbf16>
    %c0_6 = arith.constant 0 : index
    %c0_7 = arith.constant 0 : index
    %9 = vector.load %arg2[%c0_6, %c0_7] : memref<16x128xbf16, #tpu.memory_space<vmem>>, vector<16x128xbf16>
    %10 = tpu.concatenate %8, %9 in 1 : vector<16x128xbf16>, vector<16x128xbf16> -> vector<16x256xbf16>
    %c0_8 = arith.constant 0 : index
    %c0_9 = arith.constant 0 : index
    %11 = vector.load %arg6[%c0_8, %c0_9] : memref<256x16xbf16, #tpu.memory_space<vmem>>, vector<256x16xbf16>
    %cst_10 = arith.constant dense<0.000000e+00> : vector<16x16xf32>
    %12 = tpu.matmul %10, %11, %cst_10 {dimension_numbers = #tpu.dot_dimension_numbers<[1], [0], [0], [1], [0, 0, 1, 1], [], []>} : vector<16x256xbf16>, vector<256x16xbf16>, vector<16x16xf32> -> vector<16x16xf32>
    %c0_11 = arith.constant 0 : index
    %c0_12 = arith.constant 0 : index
    %13 = vector.load %arg7[%c0_11, %c0_12] : memref<1x16xf32, #tpu.memory_space<vmem>>, vector<1x16xf32>
    %14 = vector.broadcast %13 : vector<1x16xf32> to vector<16x16xf32>
    %15 = arith.addf %12, %14 : vector<16x16xf32>
    %cst_13 = arith.constant 0.000000e+00 : f32
    %16 = vector.broadcast %cst_13 : f32 to vector<16x16xf32>
    %17 = arith.maximumf %15, %16 : vector<16x16xf32>
    %18 = arith.truncf %17 : vector<16x16xf32> to vector<16x16xbf16>
    %c0_14 = arith.constant 0 : index
    %c0_15 = arith.constant 0 : index
    %19 = vector.load %arg8[%c0_14, %c0_15] : memref<16x18xbf16, #tpu.memory_space<vmem>>, vector<16x18xbf16>
    %cst_16 = arith.constant dense<0.000000e+00> : vector<16x18xf32>
    %20 = tpu.matmul %18, %19, %cst_16 {dimension_numbers = #tpu.dot_dimension_numbers<[1], [0], [0], [1], [0, 0, 1, 1], [], []>} : vector<16x16xbf16>, vector<16x18xbf16>, vector<16x18xf32> -> vector<16x18xf32>
    %c0_17 = arith.constant 0 : index
    %c0_18 = arith.constant 0 : index
    %21 = vector.load %arg9[%c0_17, %c0_18] : memref<1x18xf32, #tpu.memory_space<vmem>>, vector<1x18xf32>
    %22 = vector.broadcast %21 : vector<1x18xf32> to vector<16x18xf32>
    %23 = arith.addf %20, %22 : vector<16x18xf32>
    %cst_19 = arith.constant 0.000000e+00 : f32
    %24 = vector.broadcast %cst_19 : f32 to vector<16x18xf32>
    %25 = arith.maximumf %23, %24 : vector<16x18xf32>
    %26 = arith.truncf %25 : vector<16x18xf32> to vector<16x18xbf16>
    %c0_20 = arith.constant 0 : index
    %c0_21 = arith.constant 0 : index
    %27 = vector.load %arg10[%c0_20, %c0_21] : memref<18x4xbf16, #tpu.memory_space<vmem>>, vector<18x4xbf16>
    %cst_22 = arith.constant dense<0.000000e+00> : vector<16x4xf32>
    %28 = tpu.matmul %26, %27, %cst_22 {dimension_numbers = #tpu.dot_dimension_numbers<[1], [0], [0], [1], [0, 0, 1, 1], [], []>} : vector<16x18xbf16>, vector<18x4xbf16>, vector<16x4xf32> -> vector<16x4xf32>
    %c0_23 = arith.constant 0 : index
    %c0_24 = arith.constant 0 : index
    %29 = vector.load %arg3[%c0_23, %c0_24] : memref<16x1xf32, #tpu.memory_space<vmem>>, vector<16x1xf32>
    %c0_25 = arith.constant 0 : index
    %c0_26 = arith.constant 0 : index
    %30 = vector.load %arg11[%c0_25, %c0_26] : memref<1x4xf32, #tpu.memory_space<vmem>>, vector<1x4xf32>
    %31 = vector.broadcast %29 : vector<16x1xf32> to vector<16x4xf32>
    %32 = vector.broadcast %30 : vector<1x4xf32> to vector<16x4xf32>
    %33 = arith.mulf %31, %32 : vector<16x4xf32>
    %34 = arith.addf %28, %33 : vector<16x4xf32>
    %c0_27 = arith.constant 0 : index
    %c0_28 = arith.constant 0 : index
    %35 = vector.load %arg12[%c0_27, %c0_28] : memref<1x4xf32, #tpu.memory_space<vmem>>, vector<1x4xf32>
    %36 = vector.broadcast %35 : vector<1x4xf32> to vector<16x4xf32>
    %37 = arith.addf %34, %36 : vector<16x4xf32>
    %c0_29 = arith.constant 0 : index
    %c0_30 = arith.constant 0 : index
    %38 = vector.load %arg13[%c0_29, %c0_30] : memref<16x4xf32, #tpu.memory_space<vmem>>, vector<16x4xf32>
    tpu.vector_store %arg13[%c0_29, %c0_30], %37 {strides = array<i32>} : memref<16x4xf32, #tpu.memory_space<vmem>>, vector<16x4xf32>,
    return
  }
  func.func @transform_0(%arg0: i32) -> (i32, i32) {
    %c0_i32 = arith.constant 0 : i32
    %c0_i32_0 = arith.constant 0 : i32
    return %arg0, %c0_i32 : i32, i32
  }
  func.func @transform_1(%arg0: i32) -> (i32, i32) {
    %c0_i32 = arith.constant 0 : i32
    %c0_i32_0 = arith.constant 0 : i32
    return %arg0, %c0_i32 : i32, i32
  }
  func.func @transform_2(%arg0: i32) -> (i32, i32) {
    %c0_i32 = arith.constant 0 : i32
    %c0_i32_0 = arith.constant 0 : i32
    return %arg0, %c0_i32 : i32, i32
  }
  func.func @transform_3(%arg0: i32) -> (i32, i32) {
    %c0_i32 = arith.constant 0 : i32
    %c0_i32_0 = arith.constant 0 : i32
    %c0_i32_1 = arith.constant 0 : i32
    return %c0_i32, %c0_i32_0 : i32, i32
  }
  func.func @transform_4(%arg0: i32) -> (i32, i32) {
    %c0_i32 = arith.constant 0 : i32
    %c0_i32_0 = arith.constant 0 : i32
    %c0_i32_1 = arith.constant 0 : i32
    return %c0_i32, %c0_i32_0 : i32, i32
  }
  func.func @transform_5(%arg0: i32) -> (i32, i32) {
    %c0_i32 = arith.constant 0 : i32
    %c0_i32_0 = arith.constant 0 : i32
    %c0_i32_1 = arith.constant 0 : i32
    return %c0_i32, %c0_i32_0 : i32, i32
  }
  func.func @transform_6(%arg0: i32) -> (i32, i32) {
    %c0_i32 = arith.constant 0 : i32
    %c0_i32_0 = arith.constant 0 : i32
    %c0_i32_1 = arith.constant 0 : i32
    return %c0_i32, %c0_i32_0 : i32, i32
  }
  func.func @transform_7(%arg0: i32) -> (i32, i32) {
    %c0_i32 = arith.constant 0 : i32
    %c0_i32_0 = arith.constant 0 : i32
    %c0_i32_1 = arith.constant 0 : i32
    return %c0_i32, %c0_i32_0 : i32, i32
  }
  func.func @transform_8(%arg0: i32) -> (i32, i32) {
    %c0_i32 = arith.constant 0 : i32
    %c0_i32_0 = arith.constant 0 : i32
    %c0_i32_1 = arith.constant 0 : i32
    return %c0_i32, %c0_i32_0 : i32, i32
  }
  func.func @transform_9(%arg0: i32) -> (i32, i32) {
    %c0_i32 = arith.constant 0 : i32
    %c0_i32_0 = arith.constant 0 : i32
    %c0_i32_1 = arith.constant 0 : i32
    return %c0_i32, %c0_i32_0 : i32, i32
  }
  func.func @transform_10(%arg0: i32) -> (i32, i32) {
    %c0_i32 = arith.constant 0 : i32
    %c0_i32_0 = arith.constant 0 : i32
    %c0_i32_1 = arith.constant 0 : i32
    return %c0_i32, %c0_i32_0 : i32, i32
  }
  func.func @transform_11(%arg0: i32) -> (i32, i32) {
    %c0_i32 = arith.constant 0 : i32
    %c0_i32_0 = arith.constant 0 : i32
    %c0_i32_1 = arith.constant 0 : i32
    return %c0_i32, %c0_i32_0 : i32, i32
  }
  func.func @transform_12(%arg0: i32) -> (i32, i32) {
    %c0_i32 = arith.constant 0 : i32
    %c0_i32_0 = arith.constant 0 : i32
    return %arg0, %c0_i32 : i32, i32
  }
}

</mosaic_0001>

<bundles_post_ra>
// kernel: net16x8_forward.1
= control target key start
LH: loop header
LB: loop body
LE: loop exit
PB: predicated region body
PF: predicated region fallthrough
CT: control target
= control target key end

     0   :  { %v652_v0 = vmov 0.0   ;;  %vm653_vm0 = vmmov 0   ;;  %vm367_vm1 = vcmask 130048   ;;  %vm452_vm2 = vcmask 1040384   ;;  %s851_s3 = inlined_call_operand.vmem [shape: bf16[128,128], index: 3, kind: input, shape index: {}]   ;;  %s852_s5 = inlined_call_operand.vmem [shape: bf16[256,16], index: 5, kind: input, shape index: {}]   ;;  %s853_s0 = inlined_call_operand.vmem [shape: bf16[16,128], index: 0, kind: input, shape index: {}]   ;;  %s854_s1 = inlined_call_operand.vmem [shape: bf16[16,128], index: 1, kind: input, shape index: {}]   ;;  %s855_s4 = inlined_call_operand.vmem [shape: f32[1,128], index: 4, kind: input, shape index: {}]   ;;  %s856_s7 = inlined_call_operand.vmem [shape: bf16[16,18], index: 7, kind: input, shape index: {}]   ;;  %s857_s6 = inlined_call_operand.vmem [shape: f32[1,16], index: 6, kind: input, shape index: {}]   ;;  %s858_s9 = inlined_call_operand.vmem [shape: bf16[18,4], index: 9, kind: input, shape index: {}]   ;;  %s859_s2 = inlined_call_operand.vmem [shape: f32[16,1], index: 2, kind: input, shape index: {}]   ;;  %s860_s8 = inlined_call_operand.vmem [shape: f32[1,18], index: 8, kind: input, shape index: {}]   ;;  %s861_s10 = inlined_call_operand.vmem [shape: f32[1,4], index: 10, kind: input, shape index: {}]   ;;  %s862_s11 = inlined_call_operand.vmem [shape: f32[1,4], index: 11, kind: input, shape index: {}]   ;;  %s863_s12 = inlined_call_operand.vmem [shape: f32[16,4], index: 12, kind: output, shape index: {}]  }
   0x1   :  { %585 = vmatprep.subr.bf16.mxu0 %v652_v0  ;;  %v623_v1 = vld [vmem:[%s851_s3] sm:$0xff]   ;;  %601 = vmatprep.mubr.msk.bf16.mxu0 %vm653_vm0, %v652_v0  ;;  %v624_v2 = vld [vmem:[%s851_s3 + $0x8] sm:$0xff]   ;;  %v625_v3 = vld [vmem:[%s851_s3 + $0x10] sm:$0xff]   ;;  %v654_v53 = vmov 0   ;;  %vm448_vm3 = vcmask 146432   ;;  %vm506_vm4 = vcmask 31744  }
   0x2   :  { %586 = vmatpush3.bf16.msra.mxu0 %v623_v1  ;;  %v626_v4 = vld [vmem:[%s851_s3 + $0x18] sm:$0xff]   ;;  %v632_v5 = vld [vmem:[%s852_s5 + $0x40] sm:$0xff]   ;;  %v634_v7 = vld [vmem:[%s852_s5 + $0x48] sm:$0xff]   ;;  %622 = vset.pattern.permute.xlu0 %v654_v53 }
   0x3   :  { %587 = vmatprep.subr.bf16.mxu0 %v652_v0  ;;  %v633_v6 = vld [vmem:[%s852_s5] sm:$0xff]   ;;  %558 = vmatprep.subr.bf16.mxu1 %v632_v5  ;;  %v635_v8 = vld [vmem:[%s852_s5 + $0x8] sm:$0xff]   ;;  %v636_v9 = vld [vmem:[%s852_s5 + $0x50] sm:$0xff]  }
   0x4   :  { %559 = vmatpush3.bf16.msra.mxu1 %v633_v6  ;;  %v627_v10 = vld [vmem:[%s851_s3 + $0x20] sm:$0xff]   ;;  %v637_v11 = vld [vmem:[%s852_s5 + $0x10] sm:$0xff]   ;;  %v638_v12 = vld [vmem:[%s852_s5 + $0x58] sm:$0xff]  }
   0x5   :  { %560 = vmatprep.subr.bf16.mxu1 %v634_v7  ;;  %v628_v13 = vld [vmem:[%s851_s3 + $0x28] sm:$0xff]   ;;  %v629_v14 = vld [vmem:[%s851_s3 + $0x30] sm:$0xff]   ;;  %v639_v15 = vld [vmem:[%s852_s5 + $0x18] sm:$0xff]  }
   0x6   :  { %588 = vmatpush3.bf16.msra.mxu0 %v624_v2  ;;  %v640_v16 = vld [vmem:[%s852_s5 + $0x60] sm:$0xff]   ;;  %v642_v18 = vld [vmem:[%s852_s5 + $0x68] sm:$0xff]   ;;  %v630_v19 = vld [vmem:[%s851_s3 + $0x38] sm:$0xff]  }
   0x7   :  { %589 = vmatprep.subr.bf16.mxu0 %v652_v0  ;;  %v641_v17 = vld [vmem:[%s852_s5 + $0x20] sm:$0xff]   ;;  %v643_v20 = vld [vmem:[%s852_s5 + $0x28] sm:$0xff]   ;;  %v644_v22 = vld [vmem:[%s852_s5 + $0x70] sm:$0xff]  }
   0x8   :  { %561 = vmatpush3.bf16.msra.mxu1 %v635_v8  ;;  %v631_v21 = vld [vmem:[%s853_s0] sm:$0xff]   ;;  %v645_v23 = vld [vmem:[%s852_s5 + $0x30] sm:$0xff]   ;;  %v646_v24 = vld [vmem:[%s852_s5 + $0x78] sm:$0xff]  }
   0x9   :  { %562 = vmatprep.subr.bf16.mxu1 %v636_v9  ;;  %v647_v25 = vld [vmem:[%s852_s5 + $0x38] sm:$0xff]   ;;  %v648_v26 = vld [vmem:[%s854_s1] sm:$0xff]   ;;  %v651_v51 = vld [vmem:[%s858_s9 + $0x8] ss:$0 sps:$4 sm:$0x11]  }
   0xa   :  { %590 = vmatpush3.bf16.msra.mxu0 %v625_v3  ;;  %340 = vmatprep.mubr.bf16.mxu1 %v648_v26  ;;  %v513_v27 = vld [vmem:[%s855_s4] ss:$0 sm:$0xff]  ;;  %v454_v52 = vsel %vm452_vm2, %v651_v51, 0  ;;  %v419_v55 = vld [vmem:[%s859_s2 + $0x8] sm:$0xff] }
   0xb   :  { %591 = vmatprep.subr.bf16.mxu0 %v652_v0  ;;  %v649_v37 = vld [vmem:[%s856_s7] sm:$0xff]  }
   0xc   :  { %563 = vmatpush3.bf16.msra.mxu1 %v637_v11  ;;  %v524_v39 = vld [vmem:[%s857_s6] ss:$0 sm:$0xff] }
   0xd   :  { %564 = vmatprep.subr.bf16.mxu1 %v638_v12  ;;  %v650_v50 = vld [vmem:[%s858_s9] sm:$0xff]  }
   0xe   :  { %592 = vmatpush3.bf16.msra.mxu0 %v626_v4  ;;  %v418_v54 = vld [vmem:[%s859_s2] sm:$0xff] }
   0xf   :  { %593 = vmatprep.subr.bf16.mxu0 %v652_v0  ;;  %423 = vperm.xlu0 %622, %v418_v54   ;;  %v541_v56 = vld [vmem:[%s860_s8] ss:$0 sm:$0xff] }
  0x10   :  { %565 = vmatpush3.bf16.msra.mxu1 %v639_v15  ;;  %v544_v3 = vld [vmem:[%s861_s10] ss:$0 sm:$0xff] }
  0x11   :  { %566 = vmatprep.subr.bf16.mxu1 %v640_v16  ;;  %v548_v7 = vld [vmem:[%s862_s11] ss:$0 sm:$0xff] }
  0x12   :  { %594 = vmatpush3.bf16.msra.mxu0 %v627_v10 }
  0x13   :  { %595 = vmatprep.subr.bf16.mxu0 %v652_v0  ;;  %428 = vperm.xlu0 %622, %v419_v55  }
  0x14   :  { %567 = vmatpush3.bf16.msra.mxu1 %v641_v17 }
  0x15   :  { %568 = vmatprep.subr.bf16.mxu1 %v642_v18 }
  0x16   :  { %596 = vmatpush3.bf16.msra.mxu0 %v628_v13 }
  0x17   :  { %597 = vmatprep.subr.bf16.mxu0 %v652_v0 }
  0x18   :  { %569 = vmatpush3.bf16.msra.mxu1 %v643_v20 }
  0x19   :  { %570 = vmatprep.subr.bf16.mxu1 %v644_v22 }
  0x1a   :  { %598 = vmatpush3.bf16.msra.mxu0 %v629_v14 }
  0x1b   :  { %599 = vmatprep.subr.bf16.mxu0 %v652_v0 }
  0x1c   :  { %571 = vmatpush3.bf16.msra.mxu1 %v645_v23 }
  0x1d   :  { %572 = vmatprep.subr.bf16.mxu1 %v646_v24 }
  0x1e   :  { %600 = vmatpush3.bf16.msra.mxu0 %v630_v19 }
  0x1f   :  { %605 = vmatprep.subr.bf16.mxu0 %v652_v0 }
  0x20   :  { %573 = vmatpush3.bf16.msra.mxu1 %v647_v25 }
  0x21   :  { %602 = vmatmul.mubr.bf16.vlgmr.msra.gmra.mrb[0].mxu0 %v631_v21  ;;  %611 = vmatprep.subr.bf16.mxu1 %v652_v0 }
  0x22   :  { %607 = vmatprep.mubr.msk.bf16.mxu0 %vm653_vm0, %v652_v0  ;;  %606 = vmatpush3.bf16.msra.mxu0 %v649_v37 }
  0x8e   :  { %v424_v2 = vpop.permute.xlu0 %423 }
  0x8f   :  { %v437_v5 = vmul.f32 %v544_v3, %v424_v2 }
  0x92   :  { %v429_v4 = vpop.permute.xlu0 %428 }
  0x93   :  { %v438_v8 = vmul.f32 %v544_v3, %v429_v4 }
  0xf4   :  { %v155_v28 = vpop.f32.mrb[0].mxu0 }
  0xf5   :  { %v156_v29 = vadd.f32 %v513_v27, %v155_v28  ;;  %v603_v30 = vpop.f32.mrb[1].mxu0 }
  0xf6   :  { %v158_v31 = vpop.f32.mrb[2].mxu0 }
  0xf7   :  { %v159_v32 = vadd.f32 %v513_v27, %v158_v31  ;;  %v604_v33 = vpop.f32.mrb[3].mxu0  ;;  %v162_v34 = vmax.f32 %v156_v29, 0.0 }
  0xf9   :  { %v163_v35 = vmax.f32 %v159_v32, 0.0 }
  0xfb   :  { %v164_v36 = vpack.c.bf16 %v163_v35, %v162_v34 }
  0xfd   :  { %341 = vmatmul.mubr.bf16.vlgmr.msra.gmra.mrb[0].mxu1 %v164_v36 }
  0xfe   :  { %615 = vmatprep.mubr.msk.bf16.mxu1 %vm653_vm0, %v652_v0  ;;  %612 = vmatpush3.bf16.msra.mxu1 %v650_v50 }
  0xff   :  { %613 = vmatprep.subr.bf16.mxu1 %v652_v0 }
 0x102   :  { %614 = vmatpush3.bf16.msra.mxu1 %v454_v52 }
 0x1d0   :  { %v574_v38 = vpop.f32.mrb[0].mxu1 }
 0x1d1   :  { %v575_v40 = vpop.f32.mrb[1].mxu1 }
 0x1d2   :  { %v576_v41 = vadd.f32 %v575_v40, %v574_v38  ;;  %v577_v42 = vpop.f32.mrb[2].mxu1 }
 0x1d3   :  { %v578_v43 = vpop.f32.mrb[3].mxu1 }
 0x1d4   :  { %v343_v44 = vadd.f32 %v576_v41, %v524_v39  ;;  %v579_v45 = vadd.f32 %v578_v43, %v577_v42 }
 0x1d6   :  { %v346_v46 = vadd.f32 %v579_v45, %v524_v39  ;;  %v349_v47 = vmax.f32 %v343_v44, 0.0 }
 0x1d8   :  { %v350_v48 = vmax.f32 %v346_v46, 0.0 }
 0x1da   :  { %v351_v49 = vpack.c.bf16 %v350_v48, %v349_v47 }
 0x1dc   :  { %608 = vmatmul.mubr.msk.bf16.vlgmr.msra.gmra.mrb[4].mxu0 %vm367_vm1, %v351_v49 }
 0x2af   :  { %v405_v57 = vpop.f32.mrb[4].mxu0 }
 0x2b0   :  { %v406_v58 = vadd.f32 %v541_v56, %v405_v57  ;;  %v609_v59 = vpop.f32.mrb[5].mxu0 }
 0x2b1   :  { %v408_v60 = vpop.f32.mrb[6].mxu0 }
 0x2b2   :  { %v409_v61 = vadd.f32 %v541_v56, %v408_v60  ;;  %v610_v62 = vpop.f32.mrb[7].mxu0  ;;  %v412_v63 = vmax.f32 %v406_v58, 0.0 }
 0x2b4   :  { %v413_v0 = vmax.f32 %v409_v61, 0.0 }
 0x2b6   :  { %v414_v1 = vpack.c.bf16 %v413_v0, %v412_v63 }
 0x2b8   :  { %616 = vmatmul.mubr.msk.bf16.vlgmr.msra.gmra.mrb[4].mxu1 %vm448_vm3, %v414_v1 }
 0x38b   :  { %v490_v6 = vpop.f32.mrb[4].mxu1 }
 0x38c   :  { %v491_v9 = vadd.f32 %v490_v6, %v437_v5  ;;  %v617_v10 = vpop.f32.mrb[5].mxu1 }
 0x38d   :  { %v493_v11 = vpop.f32.mrb[6].mxu1 }
 0x38e   :  { %v504_v12 = vadd.f32 %v548_v7, %v491_v9  ;;  %v494_v13 = vadd.f32 %v493_v11, %v438_v8  ;;  %v618_v14 = vpop.f32.mrb[7].mxu1 }
 0x390   :  { %507 = vst.msk [vmem:[%s863_s12] sm:$0xff] %vm506_vm4, %v504_v12  ;;  %v505_v15 = vadd.f32 %v548_v7, %v494_v13 }
 0x392   :  { %508 = vst.msk [vmem:[%s863_s12 + $0x8] sm:$0xff] %vm506_vm4, %v505_v15 }

</bundles_post_ra>
